<compile_context>
chip_gen: v5e
topology: v5e:2x2
jax: 0.10.0
libtpu: 0.0.40
codegen_flags: <defaults>
</compile_context>

<pallas_src>
import jax
import jax.numpy as jnp
from jax.experimental import pallas as pl
from jax.experimental.pallas import tpu as pltpu


def _round_up(x, m):
    return (x + m - 1) // m * m


def qnetwork_kernel(xt_ref, w1_ref, b1_ref, w2_ref, b2_ref, w3_ref, b3_ref, o_ref):
    # fc1: (128, 64) bf16 @ (64, TB) bf16 -> (128, TB) f32 accumulator on the MXU.
    h1 = jnp.dot(w1_ref[...], xt_ref[...], preferred_element_type=jnp.float32)
    h1 = jnp.maximum(h1 + b1_ref[...], 0.0)                  # f32 bias + ReLU (VPU)
    # fc2: (128, 128) bf16 @ (128, TB) bf16 -> f32.
    h2 = jnp.dot(w2_ref[...], h1.astype(jnp.bfloat16),
                 preferred_element_type=jnp.float32)
    h2 = jnp.maximum(h2 + b2_ref[...], 0.0)
    # fc3: (1, 128) bf16 @ (128, TB) bf16 -> (1, TB) f32 — MXU dot, lane-dense result.
    out = jnp.dot(w3_ref[...], h2.astype(jnp.bfloat16),
                  preferred_element_type=jnp.float32)
    o_ref[...] = (out + b3_ref[0]).astype(o_ref.dtype)       # b3 scalar from SMEM


def qnetwork_forward(x, params, *, block_b=2048):
    """x: (B, 64) float array. Returns (B, 1) float32."""
    w1, b1, w2, b2, w3, b3 = params
    B = x.shape[0]
    F_IN, H = 64, 128

    # Batch padded to a multiple of 128 (lane width); pick the largest tile <= block_b
    # that divides the padded batch, so we never pad more than 127 rows (avoids a full
    # extra pad copy of x for ragged batches — review item on jnp.pad).
    Bp = _round_up(B, 128)
    TB = min(int(block_b), Bp)
    while Bp % TB != 0:
        TB -= 128

    # One fused wrapper pass over x: pad (if needed) + transpose + cast to bf16.
    if Bp != B:
        x = jnp.pad(x, ((0, Bp - B), (0, 0)))
    xt = x.T.astype(jnp.bfloat16)                            # (64, Bp), bf16

    # Feature-major weights (PyTorch (out,in) orientation), bf16 for the MXU.
    w1t = w1.T.astype(jnp.bfloat16)                          # (128, 64)
    w2t = w2.T.astype(jnp.bfloat16)                          # (128, 128)
    w3r = w3.reshape(1, -1).astype(jnp.bfloat16)             # (1, 128)
    b1c = b1.reshape(-1, 1).astype(jnp.float32)              # (128, 1) column
    b2c = b2.reshape(-1, 1).astype(jnp.float32)              # (128, 1)
    b3s = b3.reshape(-1).astype(jnp.float32)                 # (1,) scalar -> SMEM

    grid = (Bp // TB,)
    const = lambda shape: pl.BlockSpec(shape, lambda i: (0,) * len(shape))

    cost = pl.CostEstimate(
        flops=2 * Bp * (F_IN * H + H * H + H),
        transcendentals=0,
        bytes_accessed=Bp * F_IN * 2 + Bp * 4 + (F_IN * H + H * H + H) * 2,
    )

    out = pl.pallas_call(
        qnetwork_kernel,
        out_shape=jax.ShapeDtypeStruct((1, Bp), jnp.float32),
        grid=grid,
        in_specs=[
            pl.BlockSpec((F_IN, TB), lambda i: (0, i)),      # x^T: streamed over batch
            const(w1t.shape), const(b1c.shape),              # weights/biases resident
            const(w2t.shape), const(b2c.shape),
            const(w3r.shape),
            pl.BlockSpec(memory_space=pltpu.MemorySpace.SMEM),   # b3 scalar
        ],
        out_specs=pl.BlockSpec((1, TB), lambda i: (0, i)),   # lane-dense output tile
        compiler_params=pltpu.CompilerParams(
            dimension_semantics=("parallel",)),              # both TCs on v7x
        cost_estimate=cost,
    )(xt, w1t, b1c, w2t, b2c, w3r, b3s)

    return out[0, :B][:, None]                               # (B, 1) float32


def init_params(key):
    """Deterministic init mimicking torch.nn.Linear default (U(-1/sqrt(fan_in), +))."""
    def linear(key, fan_in, fan_out):
        kw, kb = jax.random.split(key)
        bound = 1.0 / jnp.sqrt(fan_in)
        # stored as (in, out) so the reference forward is x @ W + b
        w = jax.random.uniform(kw, (fan_in, fan_out), jnp.float32, -bound, bound)
        b = jax.random.uniform(kb, (1, fan_out), jnp.float32, -bound, bound)
        return w, b

    k1, k2, k3 = jax.random.split(key, 3)
    w1, b1 = linear(k1, 64, 128)
    w2, b2 = linear(k2, 128, 128)
    w3, b3 = linear(k3, 128, 1)
    return (w1, b1, w2, b2, w3, b3)


def reference_forward(x, params):
    w1, b1, w2, b2, w3, b3 = params
    h1 = jnp.maximum(x @ w1 + b1, 0.0)
    h2 = jnp.maximum(h1 @ w2 + b2, 0.0)
    return h2 @ w3 + b3


if __name__ == "__main__":
    key = jax.random.PRNGKey(0)
    kp, kx = jax.random.split(key)
    params = init_params(kp)

    B = 8  # small batch; input feature dim 64 as implied by fc1 = Linear(64, 128)
    x = jax.random.normal(kx, (B, 64), jnp.float32)

    out = qnetwork_forward(x, params)
    out = jax.block_until_ready(out)

    ref = reference_forward(x, params)
    assert out.shape == (B, 1)
    # bf16 inputs/weights with f32 accumulation: allow ~1% numerical budget vs f32 ref.
    assert jnp.allclose(out, ref, atol=3e-2, rtol=3e-2), "mismatch vs f32 reference"
    print("KERNEL_OK")
</pallas_src>

<mosaic_0001>
module attributes {stable_mosaic.version = 11 : i64} {
  func.func @qnetwork_kernel(%arg0: i32, %arg1: memref<64x128xbf16, #tpu.memory_space<vmem>>, %arg2: memref<128x64xbf16, #tpu.memory_space<vmem>>, %arg3: memref<128x1xf32, #tpu.memory_space<vmem>>, %arg4: memref<128x128xbf16, #tpu.memory_space<vmem>>, %arg5: memref<128x1xf32, #tpu.memory_space<vmem>>, %arg6: memref<1x128xbf16, #tpu.memory_space<vmem>>, %arg7: memref<1xf32, #tpu.memory_space<smem>>, %arg8: memref<1x128xf32, #tpu.memory_space<vmem>>) attributes {dimension_semantics = [#tpu.dimension_semantics<parallel>], iteration_bounds = array<i64: 1>, scalar_prefetch = 0 : i64, scratch_operands = 0 : i64, tpu.core_type = #tpu.core_type<tc>, window_params = [{transform_indices = @transform_0, window_bounds = array<i64: 64, 128>}, {pipeline_mode = #tpu.pipeline_mode<synchronous>, transform_indices = @transform_1, window_bounds = array<i64: 128, 64>}, {pipeline_mode = #tpu.pipeline_mode<synchronous>, transform_indices = @transform_2, window_bounds = array<i64: 128, 1>}, {pipeline_mode = #tpu.pipeline_mode<synchronous>, transform_indices = @transform_3, window_bounds = array<i64: 128, 128>}, {pipeline_mode = #tpu.pipeline_mode<synchronous>, transform_indices = @transform_4, window_bounds = array<i64: 128, 1>}, {pipeline_mode = #tpu.pipeline_mode<synchronous>, transform_indices = @transform_5, window_bounds = array<i64: 1, 128>}, {transform_indices = @transform_6, window_bounds = array<i64: 1>}, {transform_indices = @transform_7, window_bounds = array<i64: 1, 128>}]} {
    %c0 = arith.constant 0 : index
    %c0_0 = arith.constant 0 : index
    %0 = vector.load %arg2[%c0, %c0_0] : memref<128x64xbf16, #tpu.memory_space<vmem>>, vector<128x64xbf16>
    %c0_1 = arith.constant 0 : index
    %c0_2 = arith.constant 0 : index
    %1 = vector.load %arg1[%c0_1, %c0_2] : memref<64x128xbf16, #tpu.memory_space<vmem>>, vector<64x128xbf16>
    %cst = arith.constant dense<0.000000e+00> : vector<128x128xf32>
    %2 = tpu.matmul %0, %1, %cst {dimension_numbers = #tpu.dot_dimension_numbers<[1], [0], [0], [1], [0, 0, 1, 1], [], []>} : vector<128x64xbf16>, vector<64x128xbf16>, vector<128x128xf32> -> vector<128x128xf32>
    %c0_3 = arith.constant 0 : index
    %c0_4 = arith.constant 0 : index
    %3 = vector.load %arg3[%c0_3, %c0_4] : memref<128x1xf32, #tpu.memory_space<vmem>>, vector<128x1xf32>
    %4 = vector.broadcast %3 : vector<128x1xf32> to vector<128x128xf32>
    %5 = arith.addf %2, %4 : vector<128x128xf32>
    %cst_5 = arith.constant 0.000000e+00 : f32
    %6 = vector.broadcast %cst_5 : f32 to vector<128x128xf32>
    %7 = arith.maximumf %5, %6 : vector<128x128xf32>
    %c0_6 = arith.constant 0 : index
    %c0_7 = arith.constant 0 : index
    %8 = vector.load %arg4[%c0_6, %c0_7] : memref<128x128xbf16, #tpu.memory_space<vmem>>, vector<128x128xbf16>
    %9 = arith.truncf %7 : vector<128x128xf32> to vector<128x128xbf16>
    %cst_8 = arith.constant dense<0.000000e+00> : vector<128x128xf32>
    %10 = tpu.matmul %8, %9, %cst_8 {dimension_numbers = #tpu.dot_dimension_numbers<[1], [0], [0], [1], [0, 0, 1, 1], [], []>} : vector<128x128xbf16>, vector<128x128xbf16>, vector<128x128xf32> -> vector<128x128xf32>
    %c0_9 = arith.constant 0 : index
    %c0_10 = arith.constant 0 : index
    %11 = vector.load %arg5[%c0_9, %c0_10] : memref<128x1xf32, #tpu.memory_space<vmem>>, vector<128x1xf32>
    %12 = vector.broadcast %11 : vector<128x1xf32> to vector<128x128xf32>
    %13 = arith.addf %10, %12 : vector<128x128xf32>
    %cst_11 = arith.constant 0.000000e+00 : f32
    %14 = vector.broadcast %cst_11 : f32 to vector<128x128xf32>
    %15 = arith.maximumf %13, %14 : vector<128x128xf32>
    %c0_12 = arith.constant 0 : index
    %c0_13 = arith.constant 0 : index
    %16 = vector.load %arg6[%c0_12, %c0_13] : memref<1x128xbf16, #tpu.memory_space<vmem>>, vector<1x128xbf16>
    %17 = arith.truncf %15 : vector<128x128xf32> to vector<128x128xbf16>
    %cst_14 = arith.constant dense<0.000000e+00> : vector<1x128xf32>
    %18 = tpu.matmul %16, %17, %cst_14 {dimension_numbers = #tpu.dot_dimension_numbers<[1], [0], [0], [1], [0, 0, 1, 1], [], []>} : vector<1x128xbf16>, vector<128x128xbf16>, vector<1x128xf32> -> vector<1x128xf32>
    %c0_15 = arith.constant 0 : index
    %19 = memref.load %arg7[%c0_15] : memref<1xf32, #tpu.memory_space<smem>>
    %20 = vector.broadcast %19 : f32 to vector<1x128xf32>
    %21 = arith.addf %18, %20 : vector<1x128xf32>
    %c0_16 = arith.constant 0 : index
    %c0_17 = arith.constant 0 : index
    %22 = vector.load %arg8[%c0_16, %c0_17] : memref<1x128xf32, #tpu.memory_space<vmem>>, vector<1x128xf32>
    tpu.vector_store %arg8[%c0_16, %c0_17], %21 {strides = array<i32>} : memref<1x128xf32, #tpu.memory_space<vmem>>, vector<1x128xf32>,
    return
  }
  func.func @transform_0(%arg0: i32) -> (i32, i32) {
    %c0_i32 = arith.constant 0 : i32
    %c0_i32_0 = arith.constant 0 : i32
    return %c0_i32, %arg0 : i32, i32
  }
  func.func @transform_1(%arg0: i32) -> (i32, i32) {
    %c0_i32 = arith.constant 0 : i32
    %c0_i32_0 = arith.constant 0 : i32
    %c0_i32_1 = arith.constant 0 : i32
    return %c0_i32, %c0_i32_0 : i32, i32
  }
  func.func @transform_2(%arg0: i32) -> (i32, i32) {
    %c0_i32 = arith.constant 0 : i32
    %c0_i32_0 = arith.constant 0 : i32
    %c0_i32_1 = arith.constant 0 : i32
    return %c0_i32, %c0_i32_0 : i32, i32
  }
  func.func @transform_3(%arg0: i32) -> (i32, i32) {
    %c0_i32 = arith.constant 0 : i32
    %c0_i32_0 = arith.constant 0 : i32
    %c0_i32_1 = arith.constant 0 : i32
    return %c0_i32, %c0_i32_0 : i32, i32
  }
  func.func @transform_4(%arg0: i32) -> (i32, i32) {
    %c0_i32 = arith.constant 0 : i32
    %c0_i32_0 = arith.constant 0 : i32
    %c0_i32_1 = arith.constant 0 : i32
    return %c0_i32, %c0_i32_0 : i32, i32
  }
  func.func @transform_5(%arg0: i32) -> (i32, i32) {
    %c0_i32 = arith.constant 0 : i32
    %c0_i32_0 = arith.constant 0 : i32
    %c0_i32_1 = arith.constant 0 : i32
    return %c0_i32, %c0_i32_0 : i32, i32
  }
  func.func @transform_6(%arg0: i32) -> i32 {
    %c0_i32 = arith.constant 0 : i32
    %c0_i32_0 = arith.constant 0 : i32
    return %c0_i32 : i32
  }
  func.func @transform_7(%arg0: i32) -> (i32, i32) {
    %c0_i32 = arith.constant 0 : i32
    %c0_i32_0 = arith.constant 0 : i32
    return %c0_i32, %arg0 : i32, i32
  }
}

</mosaic_0001>

<bundles_post_ra>
// kernel: tpu_custom_call.1
= control target key start
LH: loop header
LB: loop body
LE: loop exit
PB: predicated region body
PF: predicated region fallthrough
CT: control target
= control target key end

     0   :  { %v728_v3 = vmov 0   ;;  %s956_s0 = inlined_call_operand.vmem [shape: bf16[64,128], index: 0, kind: input, shape index: {}]   ;;  %s957_s1 = inlined_call_operand.vmem [shape: bf16[128,64], index: 1, kind: input, shape index: {}]   ;;  %s958_s2 = inlined_call_operand.vmem [shape: f32[128,1], index: 2, kind: input, shape index: {}]   ;;  %s959_s3 = inlined_call_operand.vmem [shape: bf16[128,128], index: 3, kind: input, shape index: {}]   ;;  %s960_s4 = inlined_call_operand.vmem [shape: f32[128,1], index: 4, kind: input, shape index: {}]   ;;  %s961_s5 = inlined_call_operand.vmem [shape: bf16[1,128], index: 5, kind: input, shape index: {}]   ;;  %s962_s6 = inlined_call_operand.<no memory space> [shape: f32[1], index: 6, kind: input, shape index: {}]   ;;  %s963_s7 = inlined_call_operand.hbm [shape: f32[1,128], index: 7, kind: output, shape index: {}]  }
   0x1   :  { %v67_v0 = vld [vmem:[%s958_s2 + $0x70] sm:$0xff]  ;;  %v65_v1 = vld [vmem:[%s958_s2 + $0x60] sm:$0xff]  ;;  %v676_v2 = vld [vmem:[%s956_s0 + $0x18] sm:$0xff]  ;;  %700 = vset.pattern.permute.xlu1 %v728_v3  ;;  %699 = vset.pattern.permute.xlu0 %v728_v3 }
   0x2   :  { %141 = vperm.xlu0 %699, %v67_v0   ;;  %131 = vperm.xlu1 %700, %v65_v1   ;;  %v675_v4 = vld [vmem:[%s956_s0 + $0x10] sm:$0xff]  ;;  %v68_v6 = vld [vmem:[%s958_s2 + $0x78] sm:$0xff]  ;;  %v66_v7 = vld [vmem:[%s958_s2 + $0x68] sm:$0xff] }
   0x3   :  { %242 = vmatpush.bf16.msra.mxu0 %v676_v2  ;;  %685 = vmatpush.bf16.msra.mxu2 %v676_v2  ;;  %v63_v5 = vld [vmem:[%s958_s2 + $0x50] sm:$0xff]  ;;  %v674_v8 = vld [vmem:[%s956_s0 + $0x8] sm:$0xff] }
   0x4   :  { %701 = vset.pattern.permute.xlu2 %v728_v3 }
   0x5   :  { %121 = vperm.xlu2 %701, %v63_v5  }
   0x7   :  { %243 = vmatpush.bf16.msra.mxu0 %v675_v4  ;;  %686 = vmatpush.bf16.msra.mxu2 %v675_v4 }
   0x8   :  { %13 = vsyncpa [#allocation4], 0  ;;  %v64_v9 = vld [vmem:[%s958_s2 + $0x58] sm:$0xff]  ;;  %v673_v10 = vld [vmem:[%s956_s0] sm:$0xff]  ;;  %vm213_vm0 = vcmask 523264   ;;  %s729_s8 = smov [#allocation3]  }
   0x9   :  { %v62_v11 = vld [vmem:[%s958_s2 + $0x48] sm:$0xff]  ;;  %v61_v12 = vld [vmem:[%s958_s2 + $0x40] sm:$0xff]  ;;  %v59_v15 = vld [vmem:[%s958_s2 + $0x30] sm:$0xff]  ;;  %s566_s9 = sshll.u32 %s729_s8, 4  ;;  %s568_s11 = sshll.u32 %s963_s7, 4  ;;  %s567_s9 = int_to_ptr.vmem [resolvable:$true] %s566_s9  ;;  %s569_s11 = int_to_ptr.hbm [resolvable:$true] %s568_s11 }
   0xa   :  { %146 = vperm.xlu0 %699, %v68_v6   ;;  %136 = vperm.xlu1 %700, %v66_v7   ;;  %v665_v13 = vld [vmem:[%s957_s1] sm:$0xff]  ;;  %v670_v14 = vld [vmem:[%s957_s1 + $0x28] sm:$0xff]  ;;  %v60_v16 = vld [vmem:[%s958_s2 + $0x38] sm:$0xff] }
   0xb   :  { %244 = vmatpush.bf16.msra.mxu0 %v674_v8  ;;  %687 = vmatpush.bf16.msra.mxu2 %v674_v8  ;;  %v57_v17 = vld [vmem:[%s958_s2 + $0x20] sm:$0xff]  ;;  %v58_v18 = vld [vmem:[%s958_s2 + $0x28] sm:$0xff]  ;;  %v56_v19 = vld [vmem:[%s958_s2 + $0x18] sm:$0xff] }
   0xc   :  { %v55_v20 = vld [vmem:[%s958_s2 + $0x10] sm:$0xff]  ;;  %v666_v21 = vld [vmem:[%s957_s1 + $0x8] sm:$0xff]  ;;  %v53_v23 = vld [vmem:[%s958_s2] sm:$0xff] }
   0xd   :  { %126 = vperm.xlu2 %701, %v64_v9   ;;  %v671_v22 = vld [vmem:[%s957_s1 + $0x30] sm:$0xff]  ;;  %v54_v25 = vld [vmem:[%s958_s2 + $0x8] sm:$0xff]  ;;  %v342_v26 = vld [vmem:[%s960_s4 + $0x78] sm:$0xff] }
   0xe   :  { %v341_v24 = vld [vmem:[%s960_s4 + $0x70] sm:$0xff]  ;;  %v340_v27 = vld [vmem:[%s960_s4 + $0x68] sm:$0xff]  ;;  %v339_v28 = vld [vmem:[%s960_s4 + $0x60] sm:$0xff] }
   0xf   :  { %245 = vmatpush.bf16.msra.mxu0 %v673_v10  ;;  %688 = vmatpush.bf16.msra.mxu2 %v673_v10  ;;  %v667_v29 = vld [vmem:[%s957_s1 + $0x10] sm:$0xff]  ;;  %v672_v30 = vld [vmem:[%s957_s1 + $0x38] sm:$0xff]  ;;  %v335_v32 = vld [vmem:[%s960_s4 + $0x40] sm:$0xff] }
  0x10   :  { %v337_v31 = vld [vmem:[%s960_s4 + $0x50] sm:$0xff]  ;;  %v338_v33 = vld [vmem:[%s960_s4 + $0x58] sm:$0xff]  ;;  %v336_v34 = vld [vmem:[%s960_s4 + $0x48] sm:$0xff] }
  0x11   :  { %v334_v35 = vld [vmem:[%s960_s4 + $0x38] sm:$0xff]  ;;  %v333_v36 = vld [vmem:[%s960_s4 + $0x30] sm:$0xff]  ;;  %v331_v38 = vld [vmem:[%s960_s4 + $0x20] sm:$0xff] }
  0x12   :  { %116 = vperm.xlu1 %700, %v62_v11   ;;  %111 = vperm.xlu0 %699, %v61_v12   ;;  %v668_v37 = vld [vmem:[%s957_s1 + $0x18] sm:$0xff]  ;;  %v329_v39 = vld [vmem:[%s960_s4 + $0x10] sm:$0xff]  ;;  %v332_v40 = vld [vmem:[%s960_s4 + $0x28] sm:$0xff] }
  0x13   :  { %625 = vmatmul.msk.bf16.vlgmr.msra.gmra.mxu0 %vm213_vm0, %v665_v13  ;;  %630 = vmatmul.msk.bf16.vlgmr.msra.gmra.mxu2 %vm213_vm0, %v670_v14  ;;  %v330_v41 = vld [vmem:[%s960_s4 + $0x18] sm:$0xff]  ;;  %v328_v42 = vld [vmem:[%s960_s4 + $0x8] sm:$0xff]  ;;  %v327_v43 = vld [vmem:[%s960_s4] sm:$0xff] }
  0x14   :  { %v669_v44 = vld [vmem:[%s957_s1 + $0x20] sm:$0xff] }
  0x15   :  { %101 = vperm.xlu2 %701, %v59_v15  }
  0x1a   :  { %106 = vperm.xlu0 %699, %v60_v16   ;;  %91 = vperm.xlu1 %700, %v57_v17  }
  0x1d   :  { %96 = vperm.xlu2 %701, %v58_v18  }
  0x22   :  { %86 = vperm.xlu1 %700, %v56_v19   ;;  %81 = vperm.xlu0 %699, %v55_v20  }
  0x23   :  { %626 = vmatmul.msk.bf16.gmra.mxu0 %vm213_vm0, %v666_v21  ;;  %631 = vmatmul.msk.bf16.gmra.mxu2 %vm213_vm0, %v671_v22 }
  0x25   :  { %71 = vperm.xlu2 %701, %v53_v23  }
  0x2a   :  { %415 = vperm.xlu1 %700, %v341_v24   ;;  %76 = vperm.xlu0 %699, %v54_v25  }
  0x2d   :  { %420 = vperm.xlu2 %701, %v342_v26  }
  0x32   :  { %410 = vperm.xlu1 %700, %v340_v27   ;;  %405 = vperm.xlu0 %699, %v339_v28  }
  0x33   :  { %627 = vmatmul.msk.bf16.gmra.mxu0 %vm213_vm0, %v667_v29  ;;  %632 = vmatmul.msk.bf16.gmra.mxu2 %vm213_vm0, %v672_v30 }
  0x35   :  { %395 = vperm.xlu2 %701, %v337_v31  }
  0x3a   :  { %385 = vperm.xlu1 %700, %v335_v32   ;;  %400 = vperm.xlu0 %699, %v338_v33  }
  0x3d   :  { %390 = vperm.xlu2 %701, %v336_v34  }
  0x42   :  { %380 = vperm.xlu1 %700, %v334_v35   ;;  %375 = vperm.xlu0 %699, %v333_v36  }
  0x43   :  { %628 = vmatmul.msk.bf16.gmra.mxu0 %vm213_vm0, %v668_v37 }
  0x45   :  { %365 = vperm.xlu2 %701, %v331_v38  }
  0x4a   :  { %355 = vperm.xlu1 %700, %v329_v39   ;;  %370 = vperm.xlu0 %699, %v332_v40  }
  0x4d   :  { %360 = vperm.xlu2 %701, %v330_v41  }
  0x52   :  { %350 = vperm.xlu1 %700, %v328_v42   ;;  %345 = vperm.xlu0 %699, %v327_v43  }
  0x53   :  { %629 = vmatmul.msk.bf16.gmra.mxu0 %vm213_vm0, %v669_v44 }
  0x5f   :  { %v122_v45 = vpop.permute.xlu2 %121 }
  0x67   :  { %v127_v47 = vpop.permute.xlu2 %126 }
  0x6f   :  { %v102_v49 = vpop.permute.xlu2 %101 }
  0x74   :  { %v142_v46 = vpop.permute.xlu0 %141  ;;  %v132_v6 = vpop.permute.xlu1 %131 }
  0x77   :  { %v97_v52 = vpop.permute.xlu2 %96 }
  0x7c   :  { %v147_v48 = vpop.permute.xlu0 %146  ;;  %v137_v10 = vpop.permute.xlu1 %136 }
  0x7f   :  { %v72_v56 = vpop.permute.xlu2 %71 }
  0x84   :  { %v112_v50 = vpop.permute.xlu0 %111  ;;  %v117_v28 = vpop.permute.xlu1 %116 }
  0x8c   :  { %v107_v51 = vpop.permute.xlu0 %106  ;;  %v92_v30 = vpop.permute.xlu1 %91 }
  0x90   :  { %v247_v53 = vpop.f32.mrf.mxu0 }
  0x91   :  { %v248_v58 = vadd.f32 %v247_v53, %v72_v56  ;;  %v677_v53 = vld [vmem:[%s959_s3] sm:$0xff]  ;;  %v682_v56 = vld [vmem:[%s959_s3 + $0x28] sm:$0xff] }
  0x93   :  { %v287_v62 = vmax.f32 %v248_v58, 0.0  ;;  %v683_v58 = vld [vmem:[%s959_s3 + $0x30] sm:$0xff] }
  0x94   :  { %v910_v54 = vpop.permute.xlu0 %81  ;;  %v87_v43 = vpop.permute.xlu1 %86 }
  0x96   :  { %v272_v55 = vpop.f32.mrf.mxu2 }
  0x97   :  { %v273_v18 = vadd.f32 %v272_v55, %v122_v45  ;;  %v681_v55 = vld [vmem:[%s959_s3 + $0x20] sm:$0xff] }
  0x98   :  { %v249_v57 = vpop.f32.mrf.mxu0 }
  0x99   :  { %v297_v23 = vmax.f32 %v273_v18, 0.0 }
  0x9c   :  { %v77_v59 = vpop.permute.xlu0 %76 }
  0x9d   :  { %v250_v60 = vadd.f32 %v249_v57, %v77_v59  ;;  %v679_v57 = vld [vmem:[%s959_s3 + $0x10] sm:$0xff]  ;;  %v680_v59 = vld [vmem:[%s959_s3 + $0x18] sm:$0xff] }
  0x9e   :  { %v274_v61 = vpop.f32.mrf.mxu2 }
  0x9f   :  { %v288_v63 = vmax.f32 %v250_v60, 0.0  ;;  %v275_v19 = vadd.f32 %v274_v61, %v127_v47  ;;  %v684_v60 = vld [vmem:[%s959_s3 + $0x38] sm:$0xff] }
  0xa0   :  { %v252_v0 = vpop.f32.mrf.mxu0 }
  0xa1   :  { %v912_v1 = vpack.c.bf16 %v288_v63, %v287_v62  ;;  %v298_v24 = vmax.f32 %v275_v19, 0.0  ;;  %v253_v47 = vadd.f32 %v252_v0, %v910_v54  ;;  %v678_v54 = vld [vmem:[%s959_s3 + $0x8] sm:$0xff] }
  0xa3   :  { %v324_v27 = vpack.c.bf16 %v298_v24, %v297_v23 }
  0xa6   :  { %v277_v2 = vpop.f32.mrf.mxu2 }
  0xa7   :  { %v278_v12 = vadd.f32 %v277_v2, %v132_v6 }
  0xa8   :  { %v254_v3 = vpop.f32.mrf.mxu0 }
  0xa9   :  { %v299_v20 = vmax.f32 %v278_v12, 0.0  ;;  %v255_v44 = vadd.f32 %v254_v3, %v87_v43 }
  0xae   :  { %v279_v4 = vpop.f32.mrf.mxu2 }
  0xaf   :  { %v280_v13 = vadd.f32 %v279_v4, %v137_v10 }
  0xb0   :  { %v257_v5 = vpop.f32.mrf.mxu0 }
  0xb1   :  { %v300_v21 = vmax.f32 %v280_v13, 0.0  ;;  %v258_v41 = vadd.f32 %v257_v5, %v92_v30  ;;  %v416_v5 = vpop.permute.xlu1 %415 }
  0xb3   :  { %v325_v25 = vpack.c.bf16 %v300_v21, %v299_v20 }
  0xb6   :  { %v282_v7 = vpop.f32.mrf.mxu2 }
  0xb7   :  { %v283_v9 = vadd.f32 %v282_v7, %v142_v46  ;;  %v421_v7 = vpop.permute.xlu2 %420 }
  0xb8   :  { %v259_v8 = vpop.f32.mrf.mxu0 }
  0xb9   :  { %v301_v14 = vmax.f32 %v283_v9, 0.0  ;;  %v260_v38 = vadd.f32 %v259_v8, %v97_v52  ;;  %v411_v9 = vpop.permute.xlu1 %410 }
  0xbb   :  { %v292_v45 = vmax.f32 %v260_v38, 0.0 }
  0xbe   :  { %v284_v11 = vpop.f32.mrf.mxu2 }
  0xbf   :  { %v285_v15 = vadd.f32 %v284_v11, %v147_v48  ;;  %v291_v48 = vmax.f32 %v258_v41, 0.0  ;;  %v406_v11 = vpop.permute.xlu0 %405  ;;  %v396_v12 = vpop.permute.xlu2 %395 }
  0xc0   :  { %v262_v16 = vpop.f32.mrf.mxu0 }
  0xc1   :  { %v302_v17 = vmax.f32 %v285_v15, 0.0  ;;  %v263_v35 = vadd.f32 %v262_v16, %v102_v49  ;;  %v321_v49 = vpack.c.bf16 %v292_v45, %v291_v48  ;;  %v386_v15 = vpop.permute.xlu1 %385 }
  0xc3   :  { %v326_v22 = vpack.c.bf16 %v302_v17, %v301_v14  ;;  %v293_v42 = vmax.f32 %v263_v35, 0.0 }
  0xc5   :  { %471 = vmatpush.bf16.msra.mxu1 %v326_v22  ;;  %689 = vmatpush.bf16.msra.mxu3 %v326_v22 }
  0xc7   :  { %v401_v16 = vpop.permute.xlu0 %400  ;;  %v391_v17 = vpop.permute.xlu2 %390 }
  0xc8   :  { %v264_v26 = vpop.f32.mrf.mxu0 }
  0xc9   :  { %472 = vmatpush.bf16.msra.mxu1 %v325_v25  ;;  %690 = vmatpush.bf16.msra.mxu3 %v325_v25  ;;  %v265_v33 = vadd.f32 %v264_v26, %v107_v51  ;;  %v289_v51 = vmax.f32 %v253_v47, 0.0  ;;  %v381_v26 = vpop.permute.xlu1 %380 }
  0xcb   :  { %v294_v39 = vmax.f32 %v265_v33, 0.0 }
  0xcd   :  { %473 = vmatpush.bf16.msra.mxu1 %v324_v27  ;;  %691 = vmatpush.bf16.msra.mxu3 %v324_v27  ;;  %v322_v46 = vpack.c.bf16 %v294_v39, %v293_v42 }
  0xcf   :  { %v376_v30 = vpop.permute.xlu0 %375 }
  0xd0   :  { %v267_v29 = vpop.f32.mrf.mxu0 }
  0xd1   :  { %v268_v31 = vadd.f32 %v267_v29, %v112_v50  ;;  %v290_v50 = vmax.f32 %v255_v44, 0.0  ;;  %v356_v43 = vpop.permute.xlu1 %355 }
  0xd3   :  { %v295_v36 = vmax.f32 %v268_v31, 0.0  ;;  %v320_v52 = vpack.c.bf16 %v290_v50, %v289_v51 }
  0xd8   :  { %v269_v32 = vpop.f32.mrf.mxu0 }
  0xd9   :  { %v270_v34 = vadd.f32 %v269_v32, %v117_v28 }
  0xdb   :  { %v296_v37 = vmax.f32 %v270_v34, 0.0 }
  0xdd   :  { %v323_v40 = vpack.c.bf16 %v296_v37, %v295_v36  ;;  %v366_v36 = vpop.permute.xlu2 %365 }
  0xdf   :  { %474 = vmatpush.bf16.msra.mxu1 %v323_v40  ;;  %692 = vmatpush.bf16.msra.mxu3 %v323_v40 }
  0xe3   :  { %475 = vmatpush.bf16.msra.mxu1 %v322_v46  ;;  %693 = vmatpush.bf16.msra.mxu3 %v322_v46  ;;  %v371_v46 = vpop.permute.xlu0 %370 }
  0xe7   :  { %476 = vmatpush.bf16.msra.mxu1 %v321_v49  ;;  %694 = vmatpush.bf16.msra.mxu3 %v321_v49 }
  0xeb   :  { %477 = vmatpush.bf16.msra.mxu1 %v320_v52  ;;  %695 = vmatpush.bf16.msra.mxu3 %v320_v52  ;;  %v361_v52 = vpop.permute.xlu2 %360 }
  0xef   :  { %478 = vmatpush.bf16.msra.mxu1 %v912_v1  ;;  %696 = vmatpush.bf16.msra.mxu3 %v912_v1 }
  0xf2   :  { %479 = vmatmul.bf16.vlgmr.msra.gmra.mxu1 %v677_v53  ;;  %499 = vmatmul.bf16.vlgmr.msra.gmra.mxu3 %v681_v55 }
 0x102   :  { %484 = vmatmul.bf16.gmra.mxu1 %v678_v54  ;;  %504 = vmatmul.bf16.gmra.mxu3 %v682_v56 }
 0x112   :  { %489 = vmatmul.bf16.gmra.mxu1 %v679_v57  ;;  %509 = vmatmul.bf16.gmra.mxu3 %v683_v58  ;;  %v351_v58 = vpop.permute.xlu1 %350 }
 0x122   :  { %494 = vmatmul.bf16.gmra.mxu1 %v680_v59  ;;  %514 = vmatmul.bf16.gmra.mxu3 %v684_v60 }
 0x16f   :  { %v941_v61 = vpop.f32.mrf.mxu1 }
 0x175   :  { %v500_v62 = vpop.f32.mrf.mxu3 }
 0x176   :  { %v501_v38 = vadd.f32 %v500_v62, %v386_v15 }
 0x177   :  { %v943_v63 = vpop.f32.mrf.mxu1 }
 0x178   :  { %v528_v44 = vmax.f32 %v501_v38, 0.0  ;;  %v483_v59 = vadd.f32 %v943_v63, %v351_v58  ;;  %v546_v63 = vstv %s962_s6 }
 0x17d   :  { %v502_v0 = vpop.f32.mrf.mxu3 }
 0x17e   :  { %v503_v33 = vadd.f32 %v502_v0, %v391_v17  ;;  %v346_v0 = vpop.permute.xlu0 %345 }
 0x17f   :  { %v485_v1 = vpop.f32.mrf.mxu1 }
 0x180   :  { %v529_v40 = vmax.f32 %v503_v33, 0.0  ;;  %v486_v56 = vadd.f32 %v485_v1, %v356_v43  ;;  %v536_v1 = vld [vmem:[%s961_s5] sm:$0x1] }
 0x182   :  { %v541_v50 = vpack.c.bf16 %v529_v40, %v528_v44 }
 0x185   :  { %v505_v2 = vpop.f32.mrf.mxu3 }
 0x186   :  { %v506_v31 = vadd.f32 %v505_v2, %v396_v12  ;;  %v481_v2 = vadd.f32 %v941_v61, %v346_v0 }
 0x187   :  { %v487_v4 = vpop.f32.mrf.mxu1 }
 0x188   :  { %v530_v39 = vmax.f32 %v506_v31, 0.0  ;;  %v488_v53 = vadd.f32 %v487_v4, %v361_v52 }
 0x18a   :  { %v523_v60 = vmax.f32 %v488_v53, 0.0 }
 0x18d   :  { %v507_v3 = vpop.f32.mrf.mxu3 }
 0x18e   :  { %v508_v27 = vadd.f32 %v507_v3, %v401_v16  ;;  %v522_v3 = vmax.f32 %v486_v56, 0.0 }
 0x18f   :  { %v490_v8 = vpop.f32.mrf.mxu1 }
 0x190   :  { %v531_v34 = vmax.f32 %v508_v27, 0.0  ;;  %v491_v49 = vadd.f32 %v490_v8, %v366_v36 }
 0x192   :  { %v542_v42 = vpack.c.bf16 %v531_v34, %v530_v39  ;;  %v524_v57 = vmax.f32 %v491_v49, 0.0 }
 0x195   :  { %v510_v6 = vpop.f32.mrf.mxu3 }
 0x196   :  { %v511_v23 = vadd.f32 %v510_v6, %v406_v11  ;;  %v538_v6 = vpack.c.bf16 %v523_v60, %v522_v3 }
 0x197   :  { %v492_v13 = vpop.f32.mrf.mxu1 }
 0x198   :  { %v532_v32 = vmax.f32 %v511_v23, 0.0  ;;  %v493_v47 = vadd.f32 %v492_v13, %v371_v46 }
 0x19a   :  { %v525_v55 = vmax.f32 %v493_v47, 0.0 }
 0x19c   :  { %v539_v62 = vpack.c.bf16 %v525_v55, %v524_v57 }
 0x19d   :  { %v512_v10 = vpop.f32.mrf.mxu3 }
 0x19e   :  { %v513_v21 = vadd.f32 %v512_v10, %v411_v9 }
 0x19f   :  { %v495_v19 = vpop.f32.mrf.mxu1 }
 0x1a0   :  { %v533_v28 = vmax.f32 %v513_v21, 0.0  ;;  %v496_v45 = vadd.f32 %v495_v19, %v376_v30 }
 0x1a2   :  { %v543_v35 = vpack.c.bf16 %v533_v28, %v532_v32  ;;  %v526_v51 = vmax.f32 %v496_v45, 0.0 }
 0x1a5   :  { %v515_v14 = vpop.f32.mrf.mxu3 }
 0x1a6   :  { %v516_v18 = vadd.f32 %v515_v14, %v416_v5  ;;  %v521_v5 = vmax.f32 %v483_v59, 0.0 }
 0x1a7   :  { %v497_v37 = vpop.f32.mrf.mxu1 }
 0x1a8   :  { %v534_v24 = vmax.f32 %v516_v18, 0.0  ;;  %v498_v41 = vadd.f32 %v497_v37, %v381_v26 }
 0x1aa   :  { %v527_v48 = vmax.f32 %v498_v41, 0.0 }
 0x1ac   :  { %v540_v54 = vpack.c.bf16 %v527_v48, %v526_v51 }
 0x1ad   :  { %v517_v20 = vpop.f32.mrf.mxu3 }
 0x1ae   :  { %v518_v22 = vadd.f32 %v517_v20, %v421_v7  ;;  %v520_v7 = vmax.f32 %v481_v2, 0.0 }
 0x1b0   :  { %v535_v25 = vmax.f32 %v518_v22, 0.0  ;;  %v537_v4 = vpack.c.bf16 %v521_v5, %v520_v7 }
 0x1b2   :  { %v544_v29 = vpack.c.bf16 %v535_v25, %v534_v24 }
 0x1b4   :  { %547 = vmatpush.bf16.msrb.mxu2 %v544_v29 }
 0x1b8   :  { %548 = vmatpush.bf16.msrb.mxu2 %v543_v35 }
 0x1bc   :  { %549 = vmatpush.bf16.msrb.mxu2 %v542_v42 }
 0x1c0   :  { %550 = vmatpush.bf16.msrb.mxu2 %v541_v50 }
 0x1c4   :  { %551 = vmatpush.bf16.msrb.mxu2 %v540_v54 }
 0x1c8   :  { %552 = vmatpush.bf16.msrb.mxu2 %v539_v62 }
 0x1cc   :  { %553 = vmatpush.bf16.msrb.mxu2 %v538_v6 }
 0x1d0   :  { %554 = vmatpush.bf16.msrb.mxu2 %v537_v4 }
 0x1d3   :  { %555 = vmatmul.bf16.vlgmr.msrb.gmra.mxu2 %v536_v1 }
 0x256   :  { %v556_v61 = vpop.f32.mrf.mxu2 }
 0x257   :  { %v557_v8 = vadd.f32 %v556_v61, %v546_v63 }
 0x259   :  { %560 = vst [vmem:[#allocation3] sm:$0x1] %v557_v8 }
 0x25a   :  { %571 = dma.vmem_to_hbm [thread:$0]  %s567_s9, 16, %s569_s11, [#allocation4]  }
 0x25e   :  { %v558_v9 = vpop.f32.mrf.mxu2 }
 0x25f   :  { %726 = dma.done.wait [#allocation4], 16  }
 0x260   :  { %727 = vsyncadd [#allocation4], 4294967280 }
 0x261   :  { %576 = vsyncpa [#allocation4], 1 }

</bundles_post_ra>
